<compile_context>
chip_gen: v7x
topology: tpu7x:2x2x1
jax: 0.10.0
libtpu: 0.0.40
codegen_flags: <defaults>
</compile_context>

<pallas_src>
from functools import partial

import jax
import jax.numpy as jnp
from jax.experimental import pallas as pl
from jax.experimental.pallas import tpu as pltpu


def encoder_kernel(emb_ref, w_e2h_ref, b_e2h_ref,
                   conv_w_ref, conv_b_ref,
                   w_h2e_ref, b_h2e_ref,
                   out_ref, x_sc,
                   *, n_layer, kernel_size, seq_len):
    layer = pl.program_id(1)
    scale = jnp.float32(0.5) ** 0.5          # torch.sqrt(tensor([0.5]))
    pad = (kernel_size - 1) // 2
    R, H = x_sc.shape                         # R = Bt * L (flattened rows)
    L = seq_len
    E = emb_ref.shape[-1]

    # --- first layer step: emb2hid linear (emb gather/add done host-side) ------
    # TODO(synk): nn.Dropout is identity at inference; training-mode dropout omitted.
    @pl.when(layer == 0)
    def _():
        emb = emb_ref[...]                                              # [R, E] f32
        x_sc[...] = jnp.dot(emb.astype(jnp.bfloat16), w_e2h_ref[...],
                            preferred_element_type=jnp.float32) + b_e2h_ref[...]

    # --- conv layer `layer`: Conv1d(H -> 2H) + GLU + residual * sqrt(0.5) ------
    x = x_sc[...]                                                       # [R, H] f32
    xb = x.astype(jnp.bfloat16)

    # per-sequence row index (batch rows are concatenated along the row axis;
    # R is an exact multiple of L, asserted in the wrapper, so the circular
    # roll below never mixes sequences once the halo mask is applied)
    row_in_seq = jax.lax.broadcasted_iota(jnp.int32, (R, 1), 0) % L

    # acc[i] = sum_t x[i + t - pad] @ W_t   (x == 0 outside each sequence).
    # Shift-before-matmul: roll/mask the [R, H] input per tap (off the
    # MXU-result dependency chain), then accumulate plain lane-aligned matmuls.
    acc = None
    for t in range(kernel_size):
        s = t - pad                                                     # static shift
        if s == 0:
            xt = xb
        else:
            xs = pltpu.roll(x, shift=(-s) % R, axis=0)                  # XLU shift
            if s > 0:
                valid = row_in_seq < (L - s)
            else:
                valid = row_in_seq >= (-s)
            xt = jnp.where(valid, xs, 0.0).astype(jnp.bfloat16)
        y = jnp.dot(xt, conv_w_ref[0, t], preferred_element_type=jnp.float32)
        acc = y if acc is None else acc + y

    cb = conv_b_ref[0]                                                  # [1, 2H]
    a = acc[:, :H] + cb[:, :H]
    g = acc[:, H:] + cb[:, H:]
    x_new = (a * jax.nn.sigmoid(g) + x) * scale                         # GLU + residual
    x_sc[...] = x_new

    # --- last layer step: hid2emb linear + combine, two lane-dense stores ------
    @pl.when(layer == n_layer - 1)
    def _():
        conved = jnp.dot(x_new.astype(jnp.bfloat16), w_h2e_ref[...],
                         preferred_element_type=jnp.float32) + b_h2e_ref[...]
        combined = (conved + emb_ref[...]) * scale
        out_ref[:, :E] = conved.astype(out_ref.dtype)
        out_ref[:, E:] = combined.astype(out_ref.dtype)


_VMEM_BUDGET_BYTES = 48 * 1024 * 1024   # safe on every generation (v7x: 64 MiB/TC)


def _estimate_vmem_bytes(R, E, H, kernel_size):
    """Rough per-grid-step VMEM footprint for the chosen row tile R."""
    f32, bf16 = 4, 2
    emb_in = 2 * R * E * f32                     # input block, double-buffered
    out_blk = 2 * R * 2 * E * f32                # packed output block, double-buffered
    x_state = R * H * f32                        # carried hidden-state scratch
    conv_w = 2 * kernel_size * H * 2 * H * bf16  # streamed per-layer conv weights (dbuf)
    lin_w = 2 * 2 * E * H * bf16                 # emb2hid + hid2emb weights (dbuf)
    biases = 2 * (H + 2 * H + E) * f32
    transient = R * (2 * H * f32                 # conv accumulator
                     + H * f32                   # shifted tap
                     + H * bf16)                 # bf16 copy of x
    return emb_in + out_blk + x_state + conv_w + lin_w + biases + transient


def _pick_batch_tile(B, L, E, H, kernel_size, *, target_rows=1024,
                     vmem_budget=_VMEM_BUDGET_BYTES):
    # valid tiles: divisors of B whose flattened row count is 8-aligned
    # (second-minor block constraint) or that cover the full batch (full extent).
    cands = [bt for bt in range(1, B + 1)
             if B % bt == 0 and ((bt * L) % 8 == 0 or bt == B)]
    fits = [bt for bt in cands
            if _estimate_vmem_bytes(bt * L, E, H, kernel_size) <= vmem_budget]
    pool = fits if fits else [min(cands)]   # nothing fits -> smallest valid tile
    under = [bt for bt in pool if bt * L <= target_rows]
    bt = max(under) if under else min(pool)
    # v7x megacore hint: keep >= 2 batch tiles if possible without dropping
    # below ~512 rows per tile (on v5e/v6e the largest fitting tile wins).
    if B // bt < 2:
        alts = [b2 for b2 in pool
                if B // b2 >= 2 and b2 * L >= min(512, bt * L)]
        if alts:
            bt = max(alts)
    return bt


def encoder_forward(src, params, *, n_layer, kernel_size,
                    batch_tile=None, target_rows=1024):
    assert kernel_size % 2 == 1, "ConvS2S residual requires odd kernel_size"
    tok_table = params["tok_embedding"]     # [V, E]
    pos_table = params["pos_embedding"]     # [max_len, E]
    B, L = src.shape
    E = tok_table.shape[1]
    H = params["w_e2h"].shape[1]

    if batch_tile is None:
        batch_tile = _pick_batch_tile(B, L, E, H, kernel_size,
                                      target_rows=target_rows)
    Bt = batch_tile
    assert B % Bt == 0
    R = Bt * L
    assert R % L == 0   # circular roll + halo mask assumes whole sequences per tile

    # embedding gather + positional add: host-side glue, flattened to [B*L, E]
    emb = (tok_table[src] + pos_table[:L][None]).astype(jnp.float32)    # [B, L, E]
    emb_flat = emb.reshape(B * L, E)

    # bf16 weights for the MXU fast path (f32 accumulation inside the kernel)
    w_e2h = params["w_e2h"].astype(jnp.bfloat16)
    conv_w = params["conv_w"].astype(jnp.bfloat16)
    w_h2e = params["w_h2e"].astype(jnp.bfloat16)

    kernel = partial(encoder_kernel, n_layer=n_layer,
                     kernel_size=kernel_size, seq_len=L)

    grid = (B // Bt, n_layer)   # (row-tiles, layers); conv weights streamed per layer

    in_specs = [
        pl.BlockSpec((R, E), lambda g, l: (g, 0)),                       # emb (flat)
        pl.BlockSpec((E, H), lambda g, l: (0, 0)),                       # w_e2h (bf16)
        pl.BlockSpec((1, H), lambda g, l: (0, 0)),                       # b_e2h
        pl.BlockSpec((1, kernel_size, H, 2 * H),
                     lambda g, l: (l, 0, 0, 0)),                         # conv_w[layer]
        pl.BlockSpec((1, 1, 2 * H), lambda g, l: (l, 0, 0)),             # conv_b[layer]
        pl.BlockSpec((H, E), lambda g, l: (0, 0)),                       # w_h2e (bf16)
        pl.BlockSpec((1, E), lambda g, l: (0, 0)),                       # b_h2e
    ]
    out_specs = pl.BlockSpec((R, 2 * E), lambda g, l: (g, 0))            # packed output
    out_shape = jax.ShapeDtypeStruct((B * L, 2 * E), jnp.float32)

    vmem_limit = int(min(
        max(_estimate_vmem_bytes(R, E, H, kernel_size) * 3 // 2, 32 * 1024 * 1024),
        _VMEM_BUDGET_BYTES))

    packed = pl.pallas_call(
        kernel,
        grid=grid,
        in_specs=in_specs,
        out_specs=out_specs,
        out_shape=out_shape,
        scratch_shapes=[pltpu.VMEM((R, H), jnp.float32)],                # carried x
        compiler_params=pltpu.CompilerParams(
            dimension_semantics=("parallel", "arbitrary"),
            vmem_limit_bytes=vmem_limit),
    )(emb_flat, w_e2h, params["b_e2h"], conv_w, params["conv_b"],
      w_h2e, params["b_h2e"])

    conved = packed[:, :E].reshape(B, L, E)
    combined = packed[:, E:].reshape(B, L, E)
    return conved, combined


def encoder_reference(src, params, *, n_layer, kernel_size):
    """Pure-JAX (f32) mirror of the PyTorch forward (eval mode) for validation."""
    tok = params["tok_embedding"][src]                       # [B, L, E]
    pos = params["pos_embedding"][: src.shape[1]][None]      # [1, L, E]
    emb = tok + pos
    x = emb @ params["w_e2h"] + params["b_e2h"][0]
    pad = (kernel_size - 1) // 2
    scale = jnp.sqrt(jnp.float32(0.5))
    B, L, H = x.shape
    for layer in range(n_layer):
        xp = jnp.pad(x, ((0, 0), (pad, pad), (0, 0)))
        out = jnp.zeros((B, L, 2 * H), jnp.float32) + params["conv_b"][layer]
        for t in range(kernel_size):
            out = out + jnp.einsum("blh,ho->blo",
                                   xp[:, t:t + L], params["conv_w"][layer, t])
        a, g = out[..., :H], out[..., H:]
        x = (a * jax.nn.sigmoid(g) + x) * scale
    conved = x @ params["w_h2e"] + params["b_h2e"][0]
    combined = (conved + emb) * scale
    return conved, combined


def init_params(key, vocab, max_len, emb_dim, hid_dim, n_layer, kernel_size):
    ks = jax.random.split(key, 8)
    f32 = jnp.float32
    return {
        "tok_embedding": 0.1 * jax.random.normal(ks[0], (vocab, emb_dim), f32),
        "pos_embedding": 0.1 * jax.random.normal(ks[1], (max_len, emb_dim), f32),
        "w_e2h": jax.random.normal(ks[2], (emb_dim, hid_dim), f32) / jnp.sqrt(emb_dim),
        "b_e2h": 0.01 * jax.random.normal(ks[3], (1, hid_dim), f32),
        # conv_w[l, t] corresponds to torch conv[l].weight[:, :, t].T  -> [H, 2H]
        "conv_w": jax.random.normal(
            ks[4], (n_layer, kernel_size, hid_dim, 2 * hid_dim), f32)
            / jnp.sqrt(kernel_size * hid_dim),
        "conv_b": 0.01 * jax.random.normal(ks[5], (n_layer, 1, 2 * hid_dim), f32),
        "w_h2e": jax.random.normal(ks[6], (hid_dim, emb_dim), f32) / jnp.sqrt(hid_dim),
        "b_h2e": 0.01 * jax.random.normal(ks[7], (1, emb_dim), f32),
    }


if __name__ == "__main__":
    B, L = 2, 8
    VOCAB, MAX_LEN = 50, 100
    EMB, HID = 32, 32
    N_LAYER, KSIZE = 2, 3

    root = jax.random.PRNGKey(0)
    k_param, k_src = jax.random.split(root)
    params = init_params(k_param, VOCAB, MAX_LEN, EMB, HID, N_LAYER, KSIZE)
    src = jax.random.randint(k_src, (B, L), 0, VOCAB, dtype=jnp.int32)

    conved, combined = encoder_forward(src, params,
                                       n_layer=N_LAYER, kernel_size=KSIZE)
    conved, combined = jax.block_until_ready((conved, combined))

    ref_conved, ref_combined = encoder_reference(src, params,
                                                 n_layer=N_LAYER,
                                                 kernel_size=KSIZE)
    assert conved.shape == (B, L, EMB) and combined.shape == (B, L, EMB)
    # bf16 matmul inputs (f32 accumulation) -> loosened tolerance vs f32 reference
    assert jnp.allclose(conved, ref_conved, rtol=2e-2, atol=2e-2)
    assert jnp.allclose(combined, ref_combined, rtol=2e-2, atol=2e-2)

    print("KERNEL_OK")
</pallas_src>

<mosaic_0001>
module attributes {stable_mosaic.version = 11 : i64} {
  func.func @encoder_kernel(%arg0: i32, %arg1: i32, %arg2: memref<16x32xf32, #tpu.memory_space<vmem>>, %arg3: memref<32x32xbf16, #tpu.memory_space<vmem>>, %arg4: memref<1x32xf32, #tpu.memory_space<vmem>>, %arg5: memref<1x3x32x64xbf16, #tpu.memory_space<vmem>>, %arg6: memref<1x1x64xf32, #tpu.memory_space<vmem>>, %arg7: memref<32x32xbf16, #tpu.memory_space<vmem>>, %arg8: memref<1x32xf32, #tpu.memory_space<vmem>>, %arg9: memref<16x64xf32, #tpu.memory_space<vmem>>, %arg10: memref<16x32xf32, #tpu.memory_space<vmem>>) attributes {dimension_semantics = [#tpu.dimension_semantics<parallel>, #tpu.dimension_semantics<arbitrary>], iteration_bounds = array<i64: 1, 2>, scalar_prefetch = 0 : i64, scratch_operands = 1 : i64, tpu.core_type = #tpu.core_type<tc>, window_params = [{transform_indices = @transform_0, window_bounds = array<i64: 16, 32>}, {pipeline_mode = #tpu.pipeline_mode<synchronous>, transform_indices = @transform_1, window_bounds = array<i64: 32, 32>}, {pipeline_mode = #tpu.pipeline_mode<synchronous>, transform_indices = @transform_2, window_bounds = array<i64: 1, 32>}, {transform_indices = @transform_3, window_bounds = array<i64: 1, 3, 32, 64>}, {transform_indices = @transform_4, window_bounds = array<i64: 1, 1, 64>}, {pipeline_mode = #tpu.pipeline_mode<synchronous>, transform_indices = @transform_5, window_bounds = array<i64: 32, 32>}, {pipeline_mode = #tpu.pipeline_mode<synchronous>, transform_indices = @transform_6, window_bounds = array<i64: 1, 32>}, {transform_indices = @transform_7, window_bounds = array<i64: 16, 64>}]} {
    %cst = arith.constant 5.000000e-01 : f32
    %cst_0 = arith.constant 5.000000e-01 : f32
    %0 = math.powf %cst, %cst_0 : f32
    %c0_i32 = arith.constant 0 : i32
    %1 = arith.cmpi eq, %arg1, %c0_i32 : i32
    %2 = arith.extui %1 : i1 to i32
    %c0_i32_1 = arith.constant 0 : i32
    %3 = arith.cmpi ne, %2, %c0_i32_1 : i32
    scf.if %3 {
      %c0_32 = arith.constant 0 : index
      %c0_33 = arith.constant 0 : index
      %73 = vector.load %arg2[%c0_32, %c0_33] : memref<16x32xf32, #tpu.memory_space<vmem>>, vector<16x32xf32>
      %74 = arith.truncf %73 : vector<16x32xf32> to vector<16x32xbf16>
      %c0_34 = arith.constant 0 : index
      %c0_35 = arith.constant 0 : index
      %75 = vector.load %arg3[%c0_34, %c0_35] : memref<32x32xbf16, #tpu.memory_space<vmem>>, vector<32x32xbf16>
      %cst_36 = arith.constant dense<0.000000e+00> : vector<16x32xf32>
      %76 = tpu.matmul %74, %75, %cst_36 {dimension_numbers = #tpu.dot_dimension_numbers<[1], [0], [0], [1], [0, 0, 1, 1], [], []>} : vector<16x32xbf16>, vector<32x32xbf16>, vector<16x32xf32> -> vector<16x32xf32>
      %c0_37 = arith.constant 0 : index
      %c0_38 = arith.constant 0 : index
      %77 = vector.load %arg4[%c0_37, %c0_38] : memref<1x32xf32, #tpu.memory_space<vmem>>, vector<1x32xf32>
      %78 = vector.broadcast %77 : vector<1x32xf32> to vector<16x32xf32>
      %79 = arith.addf %76, %78 : vector<16x32xf32>
      %c0_39 = arith.constant 0 : index
      %c0_40 = arith.constant 0 : index
      %80 = vector.load %arg10[%c0_39, %c0_40] : memref<16x32xf32, #tpu.memory_space<vmem>>, vector<16x32xf32>
      tpu.vector_store %arg10[%c0_39, %c0_40], %79 {strides = array<i32>} : memref<16x32xf32, #tpu.memory_space<vmem>>, vector<16x32xf32>,
    } else {
    }
    %c0 = arith.constant 0 : index
    %c0_2 = arith.constant 0 : index
    %4 = vector.load %arg10[%c0, %c0_2] : memref<16x32xf32, #tpu.memory_space<vmem>>, vector<16x32xf32>
    %5 = arith.truncf %4 : vector<16x32xf32> to vector<16x32xbf16>
    %6 = tpu.iota {dimensions = array<i32: 0>} : vector<16x1xi32>
    %c8_i32 = arith.constant 8 : i32
    %c0_i32_3 = arith.constant 0 : i32
    %7 = arith.cmpi eq, %c8_i32, %c0_i32_3 : i32
    %c1_i32 = arith.constant 1 : i32
    %8 = arith.select %7, %c1_i32, %c8_i32 : i32
    %9 = vector.broadcast %8 : i32 to vector<16x1xi32>
    %10 = arith.remsi %6, %9 : vector<16x1xi32>
    %c0_i32_4 = arith.constant 0 : i32
    %11 = vector.broadcast %c0_i32_4 : i32 to vector<16x1xi32>
    %12 = arith.cmpi ne, %10, %11 : vector<16x1xi32>
    %c0_i32_5 = arith.constant 0 : i32
    %13 = vector.broadcast %c0_i32_5 : i32 to vector<16x1xi32>
    %14 = arith.cmpi slt, %10, %13 : vector<16x1xi32>
    %c0_i32_6 = arith.constant 0 : i32
    %15 = arith.cmpi slt, %8, %c0_i32_6 : i32
    %16 = vector.broadcast %15 : i1 to vector<16x1xi1>
    %17 = vector.broadcast %16 : vector<16x1xi1> to vector<16x1xi1>
    %18 = arith.xori %14, %17 : vector<16x1xi1>
    %19 = arith.andi %18, %12 : vector<16x1xi1>
    %20 = vector.broadcast %8 : i32 to vector<16x1xi32>
    %21 = arith.addi %10, %20 : vector<16x1xi32>
    %22 = arith.select %19, %21, %10 : vector<16x1xi1>, vector<16x1xi32>
    %c1_i32_7 = arith.constant 1 : i32
    %23 = tpu.dynamic_rotate %4 by %c1_i32_7 dim 0 : vector<16x32xf32>, i32 -> vector<16x32xf32>
    %c1_i32_8 = arith.constant 1 : i32
    %24 = vector.broadcast %c1_i32_8 : i32 to vector<16x1xi32>
    %25 = arith.cmpi sge, %22, %24 : vector<16x1xi32>
    %cst_9 = arith.constant 0.000000e+00 : f32
    %26 = vector.shape_cast %25 : vector<16x1xi1> to vector<16x1xi1>
    %27 = vector.broadcast %26 : vector<16x1xi1> to vector<16x32xi1>
    %28 = vector.broadcast %cst_9 : f32 to vector<16x32xf32>
    %29 = arith.select %27, %23, %28 : vector<16x32xi1>, vector<16x32xf32>
    %30 = arith.truncf %29 : vector<16x32xf32> to vector<16x32xbf16>
    %c0_10 = arith.constant 0 : index
    %c0_11 = arith.constant 0 : index
    %c0_12 = arith.constant 0 : index
    %c0_13 = arith.constant 0 : index
    %31 = vector.load %arg5[%c0_10, %c0_11, %c0_12, %c0_13] : memref<1x3x32x64xbf16, #tpu.memory_space<vmem>>, vector<1x1x32x64xbf16>
    %32 = vector.shape_cast %31 : vector<1x1x32x64xbf16> to vector<32x64xbf16>
    %cst_14 = arith.constant dense<0.000000e+00> : vector<16x64xf32>
    %33 = tpu.matmul %30, %32, %cst_14 {dimension_numbers = #tpu.dot_dimension_numbers<[1], [0], [0], [1], [0, 0, 1, 1], [], []>} : vector<16x32xbf16>, vector<32x64xbf16>, vector<16x64xf32> -> vector<16x64xf32>
    %c0_15 = arith.constant 0 : index
    %c1 = arith.constant 1 : index
    %c0_16 = arith.constant 0 : index
    %c0_17 = arith.constant 0 : index
    %34 = vector.load %arg5[%c0_15, %c1, %c0_16, %c0_17] : memref<1x3x32x64xbf16, #tpu.memory_space<vmem>>, vector<1x1x32x64xbf16>
    %35 = vector.shape_cast %34 : vector<1x1x32x64xbf16> to vector<32x64xbf16>
    %cst_18 = arith.constant dense<0.000000e+00> : vector<16x64xf32>
    %36 = tpu.matmul %5, %35, %cst_18 {dimension_numbers = #tpu.dot_dimension_numbers<[1], [0], [0], [1], [0, 0, 1, 1], [], []>} : vector<16x32xbf16>, vector<32x64xbf16>, vector<16x64xf32> -> vector<16x64xf32>
    %37 = arith.addf %33, %36 : vector<16x64xf32>
    %c15_i32 = arith.constant 15 : i32
    %38 = tpu.dynamic_rotate %4 by %c15_i32 dim 0 : vector<16x32xf32>, i32 -> vector<16x32xf32>
    %c7_i32 = arith.constant 7 : i32
    %39 = vector.broadcast %c7_i32 : i32 to vector<16x1xi32>
    %40 = arith.cmpi slt, %22, %39 : vector<16x1xi32>
    %cst_19 = arith.constant 0.000000e+00 : f32
    %41 = vector.shape_cast %40 : vector<16x1xi1> to vector<16x1xi1>
    %42 = vector.broadcast %41 : vector<16x1xi1> to vector<16x32xi1>
    %43 = vector.broadcast %cst_19 : f32 to vector<16x32xf32>
    %44 = arith.select %42, %38, %43 : vector<16x32xi1>, vector<16x32xf32>
    %45 = arith.truncf %44 : vector<16x32xf32> to vector<16x32xbf16>
    %c0_20 = arith.constant 0 : index
    %c2 = arith.constant 2 : index
    %c0_21 = arith.constant 0 : index
    %c0_22 = arith.constant 0 : index
    %46 = vector.load %arg5[%c0_20, %c2, %c0_21, %c0_22] : memref<1x3x32x64xbf16, #tpu.memory_space<vmem>>, vector<1x1x32x64xbf16>
    %47 = vector.shape_cast %46 : vector<1x1x32x64xbf16> to vector<32x64xbf16>
    %cst_23 = arith.constant dense<0.000000e+00> : vector<16x64xf32>
    %48 = tpu.matmul %45, %47, %cst_23 {dimension_numbers = #tpu.dot_dimension_numbers<[1], [0], [0], [1], [0, 0, 1, 1], [], []>} : vector<16x32xbf16>, vector<32x64xbf16>, vector<16x64xf32> -> vector<16x64xf32>
    %49 = arith.addf %37, %48 : vector<16x64xf32>
    %c0_24 = arith.constant 0 : index
    %c0_25 = arith.constant 0 : index
    %c0_26 = arith.constant 0 : index
    %50 = vector.load %arg6[%c0_24, %c0_25, %c0_26] : memref<1x1x64xf32, #tpu.memory_space<vmem>>, vector<1x1x64xf32>
    %51 = vector.shape_cast %50 : vector<1x1x64xf32> to vector<1x64xf32>
    %52 = vector.extract_strided_slice %49 {offsets = [0, 0], sizes = [16, 32], strides = [1, 1]} : vector<16x64xf32> to vector<16x32xf32>
    %53 = vector.extract_strided_slice %51 {offsets = [0, 0], sizes = [1, 32], strides = [1, 1]} : vector<1x64xf32> to vector<1x32xf32>
    %54 = vector.broadcast %53 : vector<1x32xf32> to vector<16x32xf32>
    %55 = arith.addf %52, %54 : vector<16x32xf32>
    %56 = vector.extract_strided_slice %49 {offsets = [0, 32], sizes = [16, 32], strides = [1, 1]} : vector<16x64xf32> to vector<16x32xf32>
    %57 = vector.extract_strided_slice %51 {offsets = [0, 32], sizes = [1, 32], strides = [1, 1]} : vector<1x64xf32> to vector<1x32xf32>
    %58 = vector.broadcast %57 : vector<1x32xf32> to vector<16x32xf32>
    %59 = arith.addf %56, %58 : vector<16x32xf32>
    %60 = arith.negf %59 : vector<16x32xf32>
    %61 = math.exp %60 : vector<16x32xf32>
    %cst_27 = arith.constant 1.000000e+00 : f32
    %62 = vector.broadcast %cst_27 : f32 to vector<16x32xf32>
    %63 = arith.addf %62, %61 : vector<16x32xf32>
    %64 = arith.divf %62, %63 : vector<16x32xf32>
    %65 = arith.mulf %55, %64 : vector<16x32xf32>
    %66 = arith.addf %65, %4 : vector<16x32xf32>
    %67 = vector.broadcast %0 : f32 to vector<16x32xf32>
    %68 = arith.mulf %66, %67 : vector<16x32xf32>
    %c0_28 = arith.constant 0 : index
    %c0_29 = arith.constant 0 : index
    %69 = vector.load %arg10[%c0_28, %c0_29] : memref<16x32xf32, #tpu.memory_space<vmem>>, vector<16x32xf32>
    tpu.vector_store %arg10[%c0_28, %c0_29], %68 {strides = array<i32>} : memref<16x32xf32, #tpu.memory_space<vmem>>, vector<16x32xf32>,
    %c1_i32_30 = arith.constant 1 : i32
    %70 = arith.cmpi eq, %arg1, %c1_i32_30 : i32
    %71 = arith.extui %70 : i1 to i32
    %c0_i32_31 = arith.constant 0 : i32
    %72 = arith.cmpi ne, %71, %c0_i32_31 : i32
    scf.if %72 {
      %73 = arith.truncf %68 : vector<16x32xf32> to vector<16x32xbf16>
      %c0_32 = arith.constant 0 : index
      %c0_33 = arith.constant 0 : index
      %74 = vector.load %arg7[%c0_32, %c0_33] : memref<32x32xbf16, #tpu.memory_space<vmem>>, vector<32x32xbf16>
      %cst_34 = arith.constant dense<0.000000e+00> : vector<16x32xf32>
      %75 = tpu.matmul %73, %74, %cst_34 {dimension_numbers = #tpu.dot_dimension_numbers<[1], [0], [0], [1], [0, 0, 1, 1], [], []>} : vector<16x32xbf16>, vector<32x32xbf16>, vector<16x32xf32> -> vector<16x32xf32>
      %c0_35 = arith.constant 0 : index
      %c0_36 = arith.constant 0 : index
      %76 = vector.load %arg8[%c0_35, %c0_36] : memref<1x32xf32, #tpu.memory_space<vmem>>, vector<1x32xf32>
      %77 = vector.broadcast %76 : vector<1x32xf32> to vector<16x32xf32>
      %78 = arith.addf %75, %77 : vector<16x32xf32>
      %c0_37 = arith.constant 0 : index
      %c0_38 = arith.constant 0 : index
      %79 = vector.load %arg2[%c0_37, %c0_38] : memref<16x32xf32, #tpu.memory_space<vmem>>, vector<16x32xf32>
      %80 = arith.addf %78, %79 : vector<16x32xf32>
      %81 = vector.broadcast %0 : f32 to vector<16x32xf32>
      %82 = arith.mulf %80, %81 : vector<16x32xf32>
      %c0_39 = arith.constant 0 : index
      %c0_40 = arith.constant 0 : index
      %83 = vector.load %arg9[%c0_39, %c0_40] : memref<16x64xf32, #tpu.memory_space<vmem>>, vector<16x32xf32>
      tpu.vector_store %arg9[%c0_39, %c0_40], %78 {strides = array<i32>} : memref<16x64xf32, #tpu.memory_space<vmem>>, vector<16x32xf32>,
      %c0_41 = arith.constant 0 : index
      %c32 = arith.constant 32 : index
      %84 = vector.load %arg9[%c0_41, %c32] : memref<16x64xf32, #tpu.memory_space<vmem>>, vector<16x32xf32>
      tpu.vector_store %arg9[%c0_41, %c32], %82 {strides = array<i32>} : memref<16x64xf32, #tpu.memory_space<vmem>>, vector<16x32xf32>,
    } else {
    }
    return
  }
  func.func @transform_0(%arg0: i32, %arg1: i32) -> (i32, i32) {
    %c0_i32 = arith.constant 0 : i32
    %c0_i32_0 = arith.constant 0 : i32
    return %arg0, %c0_i32 : i32, i32
  }
  func.func @transform_1(%arg0: i32, %arg1: i32) -> (i32, i32) {
    %c0_i32 = arith.constant 0 : i32
    %c0_i32_0 = arith.constant 0 : i32
    %c0_i32_1 = arith.constant 0 : i32
    return %c0_i32, %c0_i32_0 : i32, i32
  }
  func.func @transform_2(%arg0: i32, %arg1: i32) -> (i32, i32) {
    %c0_i32 = arith.constant 0 : i32
    %c0_i32_0 = arith.constant 0 : i32
    %c0_i32_1 = arith.constant 0 : i32
    return %c0_i32, %c0_i32_0 : i32, i32
  }
  func.func @transform_3(%arg0: i32, %arg1: i32) -> (i32, i32, i32, i32) {
    %c0_i32 = arith.constant 0 : i32
    %c0_i32_0 = arith.constant 0 : i32
    %c0_i32_1 = arith.constant 0 : i32
    %c0_i32_2 = arith.constant 0 : i32
    return %arg1, %c0_i32, %c0_i32_0, %c0_i32_1 : i32, i32, i32, i32
  }
  func.func @transform_4(%arg0: i32, %arg1: i32) -> (i32, i32, i32) {
    %c0_i32 = arith.constant 0 : i32
    %c0_i32_0 = arith.constant 0 : i32
    %c0_i32_1 = arith.constant 0 : i32
    return %arg1, %c0_i32, %c0_i32_0 : i32, i32, i32
  }
  func.func @transform_5(%arg0: i32, %arg1: i32) -> (i32, i32) {
    %c0_i32 = arith.constant 0 : i32
    %c0_i32_0 = arith.constant 0 : i32
    %c0_i32_1 = arith.constant 0 : i32
    return %c0_i32, %c0_i32_0 : i32, i32
  }
  func.func @transform_6(%arg0: i32, %arg1: i32) -> (i32, i32) {
    %c0_i32 = arith.constant 0 : i32
    %c0_i32_0 = arith.constant 0 : i32
    %c0_i32_1 = arith.constant 0 : i32
    return %c0_i32, %c0_i32_0 : i32, i32
  }
  func.func @transform_7(%arg0: i32, %arg1: i32) -> (i32, i32) {
    %c0_i32 = arith.constant 0 : i32
    %c0_i32_0 = arith.constant 0 : i32
    return %arg0, %c0_i32 : i32, i32
  }
}

</mosaic_0001>

<bundles_post_ra>
// kernel: tpu_custom_call.1
= control target key start
LH: loop header
LB: loop body
LE: loop exit
PB: predicated region body
PF: predicated region fallthrough
CT: control target
= control target key end

     0   :  { %s1727_s0 = inlined_call_operand.hbm [shape: f32[16,32], index: 0, kind: input, shape index: {}]   ;;  %s1728_s1 = inlined_call_operand.hbm [shape: bf16[32,32], index: 1, kind: input, shape index: {}]   ;;  %s1729_s2 = inlined_call_operand.hbm [shape: f32[1,32], index: 2, kind: input, shape index: {}]   ;;  %s1730_s3 = inlined_call_operand.hbm [shape: bf16[2,3,32,64], index: 3, kind: input, shape index: {}]   ;;  %s1731_s4 = inlined_call_operand.vmem [shape: f32[2,1,64], index: 4, kind: input, shape index: {}]   ;;  %s1732_s5 = inlined_call_operand.vmem [shape: bf16[32,32], index: 5, kind: input, shape index: {}]   ;;  %s1733_s6 = inlined_call_operand.vmem [shape: f32[1,32], index: 6, kind: input, shape index: {}]   ;;  %s1734_s7 = inlined_call_operand.hbm [shape: f32[16,64], index: 7, kind: output, shape index: {}]  }
   0x1   :  { %1742 = sst [smem:[#allocation16_spill]] %s1728_s1 }
   0x2   :  { %12 = vsyncpa [#allocation4], 0 }
   0x3   :  { %13 = vsyncpa [#allocation7], 0 }
   0x4   :  { %14 = vsyncpa [#allocation10], 0 }
   0x5   :  { %16 = vsyncpa [#allocation10 + $0x1], 0 }
   0x6   :  { %17 = vsyncpa [#allocation5], 0  ;;  %s1423_s24 = smov 0   ;;  %s1425_s25 = smov 0  }
   0x7   :  { %s1427_s26 = smov 0   ;;  %s1429_s27 = smov 0  }
   0x8   :  { %s1431_s28 = smov 0   ;;  %s1433_s29 = smov 0  }
   0x9 LB: > { %s1739_s30 = sadd.s32 4294967295, %s1362_s29   ;;  %p123_p0 = scmp.ne.s32.totalorder %s1346_s25, %s1342_s24  ;;  %s1362_s29 = sphi %s1433_s29, %s23_s29   ;;  %s1358_s28 = sphi %s1431_s28, %s1765_s28   ;;  %s1354_s27 = sphi %s1429_s27, %s1764_s27   ;;  %s1350_s26 = sphi %s1427_s26, %s1763_s26   ;;  %s1346_s25 = sphi %s1425_s25, %s1762_s25   ;;  %s1342_s24 = sphi %s1423_s24, %s1761_s24  }
   0xa   : > { %p1455_p1 = scmp.eq.s32.totalorder %s1739_s30, 0  ;;  %p933_p2 = scmp.ge.s32.totalorder %s1362_s29, 1 }
   0xb   : > { %p228_p3 = scmp.lt.s32.totalorder %s1362_s29, 3  ;;  %s1364_s11 = smov [#allocation6]  }
   0xc   : > { %s1743_s8 = scalar_select %p1455_p1, 1, 0 }
   0xd   : > { %p1463_p4 = por %p1455_p1, %p123_p0  ;;  %p1467_p5 = pnand %p933_p2, %p228_p3 }
   0xe   : > { %s256_s12 = sshll.u32 %s1364_s11, 4  ;;  %s1365_s14 = smov [#allocation3]   ;;  %s257_s12 = int_to_ptr.vmem [resolvable:$true] %s256_s12 }
   0xf   : > { %s1744_s9 = scalar_select %p1463_p4, 1, 0 }
  0x10   : > { %s1745_s10 = scalar_select %p1467_p5, 1, 0 }
  0x11   : > { %p1053_p6 = pneg %p1467_p5  ;;  %s243_s15 = sshll.u32 %s1365_s14, 4  ;;  %s244_s15 = int_to_ptr.vmem [resolvable:$true] %s243_s15 }
  0x12   : > { %s1747_s1 = sld [smem:[#allocation16_spill]] }
  0x13   : > { %p1475_p7 = pnand %p1053_p6, %p1455_p1 }
  0x15   : > { %p1487_p9 = pneg %p1475_p7 }
  0x18   : > { %s1160_s18 = scalar_lea.hbm %s1747_s1, 256 }
  0x19   : > { %p1161_p8 = scmp.ne.s32.totalorder %s1747_s1, %s1160_s18  ;;  %p1167_p12 = scmp.lt.u32.totalorder %s1160_s18, %s1747_s1 }
  0x1b   : > { %p1163_p10 = pnand %p1487_p9, %p1161_p8 }
  0x1d   : > { %p1164_p11 = pneg %p1163_p10 }
  0x1f   : > { %p1169_p13 = pnand %p1167_p12, %p1164_p11 }
  0x21   : > { %1172 = shalt.err (!%p1169_p13)
}
  0x22   : > { %s1173_s24 = scalar_lea.vmem %s257_s12, 256  ;;  %p1181_p6 = scmp.lt.s32.totalorder %s257_s12, %s257_s12 }
  0x23   : > { %p1174_p0 = scmp.ne.s32.totalorder %s257_s12, %s1173_s24  ;;  %p1182_p4 = scmp.lt.s32.totalorder %s1173_s24, %s1173_s24 }
  0x25   : > { %p1176_p2 = pnand %p1174_p0, %p1487_p9  ;;  %p1183_p1 = por %p1182_p4, %p1181_p6 }
  0x27   : > { %p1177_p3 = pneg %p1176_p2 }
  0x29   : > { %p1184_p5 = pnand %p1183_p1, %p1177_p3 }
  0x2b   : > { %1187 = shalt.err (!%p1184_p5)
}
  0x2c   : > { %s1740_s11 = smov 64   ;;  %s1741_s14 = smov 4  }
  0x2d   : > { %1059 = dma.hbm_to_vmem [thread:$0]  (!%p1475_p7), %s1747_s1, 256, %s257_s12, [#allocation7], %s1740_s11, %s1740_s11, %s1741_s14  }
  0x2e   : > { %s1188_s20 = scalar_lea.hbm %s1727_s0, 256 }
  0x2f   : > { %p1189_p1 = scmp.ne.s32.totalorder %s1727_s0, %s1188_s20  ;;  %p1195_p8 = scmp.lt.u32.totalorder %s1188_s20, %s1727_s0 }
  0x31   : > { %p1191_p4 = pnand %p1189_p1, %p1487_p9 }
  0x33   : > { %p1192_p5 = pneg %p1191_p4 }
  0x35   : > { %p1197_p10 = pnand %p1195_p8, %p1192_p5 }
  0x37   : > { %1200 = shalt.err (!%p1197_p10)
}
  0x38   : > { %s1201_s16 = scalar_lea.vmem %s244_s15, 256  ;;  %p1209_p0 = scmp.lt.s32.totalorder %s244_s15, %s244_s15 }
  0x39   : > { %p1202_p11 = scmp.ne.s32.totalorder %s244_s15, %s1201_s16  ;;  %p1210_p2 = scmp.lt.s32.totalorder %s1201_s16, %s1201_s16 }
  0x3b   : > { %p1204_p12 = pnand %p1202_p11, %p1487_p9  ;;  %p1211_p3 = por %p1210_p2, %p1209_p0 }
  0x3d   : > { %p1205_p13 = pneg %p1204_p12 }
  0x3f   : > { %p1212_p6 = pnand %p1211_p3, %p1205_p13 }
  0x41   : > { %1215 = shalt.err (!%p1212_p6)
}
  0x42   : > { %s1368_s12 = smov 128   ;;  %s1369_s17 = smov 8  }
  0x43   : > { %1056 = dma.hbm_to_vmem [thread:$0]  (!%p1475_p7), %s1727_s0, 256, %s244_s15, [#allocation4], %s1368_s12, %s1368_s12, %s1369_s17  }
  0x44   : > { %s1370_s19 = smov [#allocation8]   ;;  %s1216_s24 = scalar_lea.hbm %s1729_s2, 16 }
  0x45   : > { %s270_s20 = sshll.u32 %s1370_s19, 4  ;;  %p1217_p1 = scmp.ne.s32.totalorder %s1729_s2, %s1216_s24  ;;  %s271_s20 = int_to_ptr.vmem [resolvable:$true] %s270_s20 }
  0x46   : > { %p1223_p8 = scmp.lt.u32.totalorder %s1216_s24, %s1729_s2 }
  0x47   : > { %p1219_p4 = pnand %p1217_p1, %p1487_p9 }
  0x49   : > { %p1220_p5 = pneg %p1219_p4 }
  0x4b   : > { %p1225_p10 = pnand %p1223_p8, %p1220_p5 }
  0x4d   : > { %1228 = shalt.err (!%p1225_p10)
}
  0x4e   : > { %s1229_s15 = scalar_lea.vmem %s271_s20, 16  ;;  %s1236_s12 = scalar_lea.vmem %s271_s20, 32 }
  0x4f   : > { %p1230_p11 = scmp.ne.s32.totalorder %s271_s20, %s1229_s15  ;;  %p1237_p0 = scmp.lt.s32.totalorder %s271_s20, %s271_s20 }
  0x50   : > { %p1238_p2 = scmp.lt.s32.totalorder %s1236_s12, %s1229_s15 }
  0x51   : > { %p1232_p12 = pnand %p1230_p11, %p1487_p9 }
  0x52   : > { %p1239_p3 = por %p1238_p2, %p1237_p0 }
  0x53   : > { %p1233_p13 = pneg %p1232_p12 }
  0x55   : > { %p1240_p6 = pnand %p1239_p3, %p1233_p13 }
  0x57   : > { %1243 = shalt.err (!%p1240_p6)
}
  0x58   : > { %1062 = dma.hbm_to_vmem [thread:$0]  (!%p1475_p7), %s1729_s2, 16, %s271_s20, [#allocation7]  }
  0x59   : > { %s32_s1 = sadd.s32 1, %s1358_s28  ;;  %s110_s21 = sadd.s32 1, %s1350_s26 }
  0x5a   : > { %p33_p9 = scmp.ge.s32.totalorder %s32_s1, 2  ;;  %p117_p1 = scmp.ne.s32.totalorder %s1350_s26, %s1346_s25 }
  0x5b   : > { %p118_p4 = scmp.eq.s32.totalorder %s1362_s29, 0  ;;  %p1070_p8 = scmp.lt.s32.totalorder %s1362_s29, 2 }
  0x5c   : > { %s1767_s1 = smov (%p33_p9, %s32_s1), 0  ;;  %s287_s14 = sand.u32 1, %s1350_s26  }
  0x5d   : > { %p119_p5 = por %p118_p4, %p117_p1  ;;  %s107_s13 = ssub.s32 %s1358_s28, %s1767_s1 }
  0x5e   : > { %p108_p10 = scmp.eq.s32.totalorder %s107_s13, 0  ;;  %s1032_s30 = smul.u32 48, %s287_s14 }
  0x5f   : > { %p1553_p11 = pnand %p1070_p8, %p119_p5  ;;  %s1033_s20 = smul.u32 768, %s1358_s28 }
  0x60   : > { %s1558_s19 = scalar_select %p108_p10, %s1350_s26, %s110_s21  }
  0x61   : > { %s291_s22 = scalar_lea.vmem [#allocation9], %s1032_s30  ;;  %s1564_s15 = scalar_lea.hbm %s1730_s3, %s1033_s20 }
  0x62   : > { %s298_s23 = sshll.u32 %s291_s22, 4  ;;  %s1568_s12 = scalar_lea.sflag [#allocation10], %s287_s14  ;;  %s1566_s23 = int_to_ptr.vmem [resolvable:$true] %s298_s23 }
  0x63   : > { %s1244_s11 = scalar_lea.hbm %s1564_s15, 768  ;;  %p1246_p12 = pneg %p1553_p11 }
  0x64   : > { %p1245_p7 = scmp.ne.s32.totalorder %s1564_s15, %s1244_s11  ;;  %s1249_s13 = scalar_lea.hbm %s1730_s3, 1536 }
  0x65   : > { %p1250_p2 = scmp.lt.u32.totalorder %s1564_s15, %s1730_s3  ;;  %p1251_p3 = scmp.lt.u32.totalorder %s1249_s13, %s1244_s11 }
  0x66   : > { %p1247_p13 = pnand %p1246_p12, %p1245_p7  ;;  %p1253_p9 = scmp.lt.u32.totalorder %s1244_s11, %s1564_s15 }
  0x67   : > { %p1252_p6 = por %p1251_p3, %p1250_p2 }
  0x68   : > { %p1248_p0 = pneg %p1247_p13 }
  0x69   : > { %p1254_p1 = por %p1253_p9, %p1252_p6 }
  0x6b   : > { %p1255_p4 = pnand %p1254_p1, %p1248_p0 }
  0x6d   : > { %1258 = shalt.err (!%p1255_p4)
}
  0x6e   : > { %s1259_s14 = scalar_lea.vmem %s1566_s23, 768  ;;  %s1371_s22 = smov [#allocation9]  }
  0x6f   : > { %p1260_p5 = scmp.ne.s32.totalorder %s1566_s23, %s1259_s14  ;;  %s1264_s24 = sshll.u32 %s1371_s22, 4  ;;  %s1265_s24 = int_to_ptr.vmem [resolvable:$false] %s1264_s24 }
  0x70   : > { %s1266_s16 = scalar_lea.vmem %s1265_s24, 1536  ;;  %p1267_p7 = scmp.lt.s32.totalorder %s1566_s23, %s1265_s24 }
  0x71   : > { %p1262_p8 = pnand %p1260_p5, %p1246_p12  ;;  %p1268_p13 = scmp.lt.s32.totalorder %s1266_s16, %s1259_s14 }
  0x73   : > { %p1263_p10 = pneg %p1262_p8  ;;  %p1269_p2 = por %p1268_p13, %p1267_p7 }
  0x75   : > { %p1270_p3 = pnand %p1269_p2, %p1263_p10 }
  0x77   : > { %1273 = shalt.err (!%p1270_p3)
}
  0x78   : > { %s1750_s11 = smov 4   ;;  %s1751_s17 = smov 64  }
  0x79   : > { %1066 = dma.hbm_to_vmem [thread:$0]  (!%p1553_p11), %s1564_s15, 768, %s1566_s23, %s1568_s12, %s1751_s17, %s1751_s17, %s1750_s11  }
  0x7a   : > { %p1752_p12 = scmp.ne.s32.totalorder %s1745_s10, 0 }
  0x7b   : > { %p1753_p0 = scmp.ne.s32.totalorder (!%p1752_p12), %s1743_s8, 0 }
  0x7c   : > { %316 = sbr.rel (%p1752_p12) target bundleno = 1117 (0x45d), region = 48 }
  0x83   : > { %1325 = dma.done.wait (%p1753_p0), [#allocation4], 256  }
  0x84   : > { %1327 = vsyncadd (%p1753_p0), [#allocation4], 4294967040 }
  0x85   : > { %1329 = dma.done.wait (%p1753_p0), [#allocation7], 272  }
  0x86   : > { %1331 = vsyncadd (%p1753_p0), [#allocation7], 4294967024  ;;  %s330_s18 = sand.u32 1, %s1346_s25   ;;  %p1754_p11 = scmp.ne.s32.totalorder %s1744_s9, 0 }
  0x87   : > { %s1034_s21 = smul.u32 48, %s330_s18  ;;  %s331_s23 = scalar_lea.sflag [#allocation10], %s330_s18 }
  0x89   : > { %s1610_s15 = scalar_lea.vmem [#allocation9], %s1034_s21 }
  0x8a   : > { %1333 = dma.done.wait (%p1754_p11), %s331_s23, 768  }
  0x8b   : > { %1335 = vsyncadd (%p1754_p11), %s331_s23, 4294966528  ;;  %p364_p6 = scmp.lt.s32.totalorder %s1354_s27, 1  ;;  %p943_p9 = scmp.ne.s32.totalorder %s1354_s27, 0 }
  0x8c   : > { %v1142_v0 = vld [vmem:[#allocation6] sm:$0xff] (!%p943_p9)   ;;  %v1372_v1 = vmov (!%p943_p9), 0.0   ;;  %v1143_v2 = vld [vmem:[#allocation6 + $0x8] sm:$0xff] (!%p943_p9)   ;;  %vm1373_vm0 = vmmov (!%p943_p9), 0   ;;  %v373_v3 = vld [vmem:[#allocation3] sm:$0xff] (!%p943_p9)  ;;  %vm399_vm1 = vcmask (!%p943_p9), 261120  }
  0x8d   : > { %s1618_s10 = scalar_select %p364_p6, %s1354_s27, 1 }
  0x8e   : > { %372 = sbr.rel (%p943_p9) target bundleno = 367 (0x16f), region = 68  ;;  %992 = vmatprep.subr.bf16.mxu0 (!%p943_p9), %v1372_v1  ;;  %996 = vmatprep.mubr.msk.bf16.mxu0 (!%p943_p9), %vm1373_vm0, %v1372_v1  ;;  %v374_v4 = vld [vmem:[#allocation3 + $0x8] sm:$0xff] (!%p943_p9)  ;;  %v944_v6 = vld [vmem:[#allocation8] ss:$0 sm:$0xff] (!%p943_p9) }
  0x8f   : > { %s366_s13 = scalar_lea.vmem %s1731_s4, %s1618_s10  ;;  %993 = vmatpush3.bf16.msra.mxu0 (!%p943_p9), %v1142_v0  ;;  %v375_v5 = vpack.c.bf16 (!%p943_p9), %v374_v4, %v373_v3 }
  0x90   : > { %994 = vmatprep.subr.bf16.mxu0 (!%p943_p9), %v1372_v1 }
  0x93   : > { %995 = vmatpush3.bf16.msra.mxu0 (!%p943_p9), %v1143_v2 }
  0x96   : > { %997 = vmatmul.mubr.msk.bf16.vlgmr.msra.gmra.mrb[0].mxu0 %vm399_vm1, %v375_v5 }
 0x169   : > { %v437_v7 = vpop.f32.mrb[0].mxu0 }
 0x16a   : > { %v438_v8 = vadd.f32 %v944_v6, %v437_v7  ;;  %v998_v9 = vpop.f32.mrb[1].mxu0 }
 0x16b   : > { %v440_v10 = vpop.f32.mrb[2].mxu0 }
 0x16c   : > { %444 = vst.msk [vmem:[#allocation2] sm:$0xff] %vm399_vm1, %v438_v8  ;;  %v441_v11 = vadd.f32 %v944_v6, %v440_v10  ;;  %v999_v12 = vpop.f32.mrb[3].mxu0 }
 0x16e   : > { %445 = vst.msk [vmem:[#allocation2 + $0x8] sm:$0xff] %vm399_vm1, %v441_v11 }
 0x16f PF: > { %v1144_v13 = vld [vmem:[%s1610_s15 + $0x10] sm:$0xff]   ;;  %v449_v14 = vlaneseq  ;;  %v1374_v15 = vmov 0.0   ;;  %v1145_v16 = vld [vmem:[%s1610_s15] sm:$0xff]   ;;  %v1146_v17 = vld [vmem:[%s1610_s15 + $0x18] sm:$0xff]   ;;  %vm1375_vm2 = vmmov 0   ;;  %vm511_vm3 = vcmask 261120  }
 0x170   : > { %1000 = vmatprep.subr.bf16.mxu0 %v1374_v15  ;;  %1008 = vmatprep.subr.bf16.mxu1 %v1374_v15  ;;  %v1147_v18 = vld [vmem:[%s1610_s15 + $0x8] sm:$0xff]   ;;  %v1148_v23 = vld [vmem:[%s1610_s15 + $0x20] sm:$0xff]   ;;  %s1376_s20 = smov 96   ;;  %p968_p1 = scmp.ne.s32.totalorder %s1354_s27, 1 }
 0x171   : > { %1001 = vmatpush3.bf16.msra.mxu0 %v1144_v13  ;;  %1004 = vmatprep.mubr.msk.bf16.mxu0 %vm1375_vm2, %v1374_v15  ;;  %v450_v19 = vshrl.u32 %v449_v14, 7  ;;  %v1149_v37 = vld [vmem:[%s1610_s15 + $0x28] sm:$0xff]   ;;  %vm1378_vm10 = vmmov (!%p968_p1), 0   ;;  %s1379_s17 = smov (!%p968_p1), 32   ;;  %vm814_vm11 = vcmask (!%p968_p1), 523520  }
 0x172   : > { %1009 = vmatpush3.bf16.msra.mxu1 %v1145_v16  ;;  %1002 = vmatprep.subr.bf16.mxu0 %v1374_v15  ;;  %v965_v55 = vld [vmem:[%s366_s13] ss:$0 sm:$0xff]  ;;  %v1377_v16 = vmov (!%p968_p1), 0.0  }
 0x173   : > { %1010 = vmatprep.subr.bf16.mxu1 %v1374_v15  ;;  %v1630_v20 = vld [vmem:[#allocation2] sm:$0xff]  ;;  %1012 = vmatprep.mubr.msk.bf16.mxu1 %vm1375_vm2, %v1374_v15  ;;  %v451_v24 = vadd.s32 8, %v450_v19  ;;  %v456_v25 = vand.u32 7, %v450_v19  ;;  %vm478_vm4 = vcmp.lt.s32.totalorder %v450_v19, 1  ;;  %vm614_vm7 = vcmp.lt.s32.totalorder %v450_v19, 7 }
 0x174   : > { %v476_v26 = vrot.slane %v1630_v20, 7  ;;  %v612_v31 = vrot.slane %v1630_v20, 1  ;;  %v969_v19 = vld [vmem:[%s1733_s6] ss:$0 sm:$0xff] (!%p968_p1) }
 0x175   : > { %v1632_v21 = vld [vmem:[#allocation2 + $0x8] sm:$0xff]  ;;  %1003 = vmatpush3.bf16.msra.mxu0 %v1146_v17  ;;  %v463_v28 = vand.u32 7, %v451_v24  ;;  %vm1640_vm5 = vcmp.ge.s32.totalorder %v456_v25, 1  ;;  %vm1644_vm6 = vcmp.lt.s32.totalorder %v456_v25, 7  ;;  %v799_v25 = vld [vmem:[#allocation3 + $0x8] sm:$0xff] (!%p968_p1) }
 0x176   : > { %v448_v22 = vpack.c.bf16 %v1632_v21, %v1630_v20  ;;  %v477_v27 = vrot.slane %v1632_v21, 7  ;;  %1011 = vmatpush3.bf16.msra.mxu1 %v1147_v18  ;;  %1016 = vmatprep.subr.bf16.mxu0 %v1374_v15  ;;  %v613_v34 = vrot.slane %v1632_v21, 1  ;;  %v1159_v17 = vld [vmem:[%s1732_s5 + $0x8] sm:$0xff] (!%p968_p1)  }
 0x177   : > { %vm482_vm8 = vcmp.ge.s32.totalorder %v463_v28, 1  ;;  %vm618_vm9 = vcmp.lt.s32.totalorder %v463_v28, 7 }
 0x178   : > { %v479_v32 = vsel %vm478_vm4, %v476_v26, %v477_v27  ;;  %v480_v33 = vsel %vm478_vm4, %v477_v27, %v476_v26  ;;  %1005 = vmatmul.mubr.msk.bf16.vlgmr.msra.gmra.mrb[0].mxu0 %vm511_vm3, %v448_v22  ;;  %v615_v38 = vsel %vm614_vm7, %v612_v31, %v613_v34  ;;  %v616_v39 = vsel %vm614_vm7, %v613_v34, %v612_v31 }
 0x179   : > { %v487_v35 = vsel %vm1640_vm5, %v480_v33, 0.0  ;;  %1017 = vmatpush3.bf16.msra.mxu0 %v1148_v23  ;;  %v488_v36 = vsel %vm482_vm8, %v479_v32, 0.0  ;;  %1020 = vmatprep.mubr.msk.bf16.mxu0 %vm1375_vm2, %v1374_v15  ;;  %v623_v41 = vsel %vm1644_vm6, %v615_v38, 0.0  ;;  %v624_v42 = vsel %vm618_vm9, %v616_v39, 0.0 }
 0x17a   : > { %v489_v40 = vpack.c.bf16 %v488_v36, %v487_v35  ;;  %1018 = vmatprep.subr.bf16.mxu0 %v1374_v15  ;;  %v625_v43 = vpack.c.bf16 %v624_v42, %v623_v41  ;;  %v1158_v15 = vld [vmem:[%s1732_s5] sm:$0xff] (!%p968_p1)  }
 0x17c   : > { %1013 = vmatmul.mubr.msk.bf16.vlgmr.msra.gmra.mrb[0].mxu1 %vm511_vm3, %v489_v40 }
 0x17d   : > { %1019 = vmatpush3.bf16.msra.mxu0 %v1149_v37 }
 0x17e   : > { %1024 = vmatprep.subr.bf16.mxu0 (!%p968_p1), %v1377_v16 }
 0x180   : > { %1021 = vmatmul.mubr.msk.bf16.vlgmr.msra.gmra.mrb[4].mxu0 %vm511_vm3, %v625_v43 }
 0x181   : > { %1025 = vmatpush3.bf16.msra.mxu0 (!%p968_p1), %v1158_v15  ;;  %1028 = vmatprep.mubr.msk.bf16.mxu0 (!%p968_p1), %vm1378_vm10, %v1377_v16 }
 0x182   : > { %1026 = vmatprep.subr.bf16.mxu0 (!%p968_p1), %v1377_v16 }
 0x185   : > { %1027 = vmatpush3.bf16.msra.mxu0 (!%p968_p1), %v1159_v17 }
 0x24b   : > { %v549_v44 = vpop.f32.mrb[0].mxu0 }
 0x24c   : > { %v1006_v45 = vpop.f32.mrb[1].mxu0 }
 0x24d   : > { %v552_v46 = vpop.f32.mrb[2].mxu0 }
 0x24e   : > { %v1007_v47 = vpop.f32.mrb[3].mxu0 }
 0x24f   : > { %v605_v48 = vpop.f32.mrb[0].mxu1 }
 0x250   : > { %v606_v49 = vadd.f32 %v605_v48, %v549_v44  ;;  %v1014_v50 = vpop.f32.mrb[1].mxu1 }
 0x251   : > { %v608_v51 = vpop.f32.mrb[2].mxu1 }
 0x252   : > { %v609_v52 = vadd.f32 %v608_v51, %v552_v46  ;;  %v1015_v53 = vpop.f32.mrb[3].mxu1 }
 0x253   : > { %v680_v54 = vpop.f32.mrb[4].mxu0 }
 0x254   : > { %v687_v56 = vadd.f32 %v680_v54, %v606_v49  ;;  %v1022_v57 = vpop.f32.mrb[5].mxu0 }
 0x255   : > { %v683_v58 = vpop.f32.mrb[6].mxu0 }
 0x256   : > { %v696_v59 = vadd.f32 %v965_v55, %v687_v56  ;;  %v688_v60 = vadd.f32 %v683_v58, %v609_v52  ;;  %v1023_v61 = vpop.f32.mrb[7].mxu0 }
 0x258   : > { %v966_v62 = vmul.f32 -1.442695, %v696_v59  ;;  %v697_v63 = vadd.f32 %v965_v55, %v688_v60 }
 0x25a   : > { %1150 = vpow2.f32 %v966_v62  ;;  %v967_v0 = vmul.f32 -1.442695, %v697_v63 }
 0x25c   : > { %1152 = vpow2.f32 %v967_v0 }
 0x264   : > { %v1151_v1 = vpop.eup %1150 }
 0x265   : > { %v704_v2 = vadd.f32 1.0, %v1151_v1 }
 0x266   : > { %v1153_v3 = vpop.eup %1152 }
 0x267   : > { %1154 = vrcp.f32 %v704_v2  ;;  %v705_v4 = vadd.f32 1.0, %v1153_v3 }
 0x269   : > { %1156 = vrcp.f32 %v705_v4 }
 0x271   : > { %v1155_v5 = vpop.eup %1154 }
 0x272   : > { %712 = vrot.lane.b32.xlu0 %v1155_v5, %s1376_s20 }
 0x273   : > { %v1157_v6 = vpop.eup %1156 }
 0x276   : > { %714 = vrot.lane.b32.xlu0 %v1157_v6, %s1376_s20 }
 0x2e4   : > { %v713_v7 = vpop.permute.xlu0 %712 }
 0x2e5   : > { %v718_v8 = vmul.f32 %v713_v7, %v696_v59 }
 0x2e7   : > { %v720_v9 = vadd.f32 %v718_v8, %v1630_v20 }
 0x2e8   : > { %v715_v10 = vpop.permute.xlu0 %714 }
 0x2e9   : > { %v722_v11 = vmul.f32 0.70710677, %v720_v9  ;;  %v719_v12 = vmul.f32 %v715_v10, %v697_v63  ;;  %729 = sbr.rel (%p968_p1) target bundleno = 1091 (0x443), region = 72 }
 0x2eb   : > { %724 = vst.msk [vmem:[#allocation2] sm:$0xff] %vm511_vm3, %v722_v11  ;;  %v721_v13 = vadd.f32 %v719_v12, %v1632_v21  ;;  %v798_v21 = vld [vmem:[#allocation3] sm:$0xff] (!%p968_p1) }
 0x2ed   : > { %v723_v14 = vmul.f32 0.70710677, %v721_v13 }
 0x2ef   : > { %725 = vst.msk [vmem:[#allocation2 + $0x8] sm:$0xff] %vm511_vm3, %v723_v14  ;;  %v730_v18 = vpack.c.bf16 (!%p968_p1), %v723_v14, %v722_v11 }
 0x2f1   : > { %1029 = vmatmul.mubr.msk.bf16.vlgmr.msra.gmra.mrb[0].mxu0 %vm511_vm3, %v730_v18 }
 0x3c4   : > { %v791_v20 = vpop.f32.mrb[0].mxu0 }
 0x3c5   : > { %v792_v22 = vadd.f32 %v969_v19, %v791_v20  ;;  %v1030_v23 = vpop.f32.mrb[1].mxu0 }
 0x3c6   : > { %v794_v24 = vpop.f32.mrb[2].mxu0 }
 0x3c7   : > { %804 = vst.msk [vmem:[#allocation11] sm:$0xff] %vm511_vm3, %v792_v22  ;;  %v795_v26 = vadd.f32 %v969_v19, %v794_v24  ;;  %v1031_v27 = vpop.f32.mrb[3].mxu0  ;;  %v800_v28 = vadd.f32 %v798_v21, %v792_v22 }
 0x3c9   : > { %v801_v29 = vadd.f32 %v799_v25, %v795_v26  ;;  %805 = vst.msk [vmem:[#allocation11 + $0x8] sm:$0xff] %vm511_vm3, %v795_v26  ;;  %v802_v30 = vmul.f32 0.70710677, %v800_v28 }
 0x3cb   : > { %808 = vrot.lane.b32.xlu0 %v802_v30, %s1379_s17  ;;  %v803_v31 = vmul.f32 0.70710677, %v801_v29 }
 0x3cf   : > { %810 = vrot.lane.b32.xlu0 %v803_v31, %s1379_s17 }
 0x43d   : > { %v809_v32 = vpop.permute.xlu0 %808 }
 0x43e   : > { %815 = vst.msk [vmem:[#allocation11] sm:$0xff] %vm814_vm11, %v809_v32 }
 0x441   : > { %v811_v33 = vpop.permute.xlu0 %810 }
 0x442   : > { %816 = vst.msk [vmem:[#allocation11 + $0x8] sm:$0xff] %vm814_vm11, %v811_v33 }
 0x443 PF: > { %s1759_s18 = sadd.s32 4294967295, %s1362_s29   ;;  %s1380_s23 = smov [#allocation11]  }
 0x444   : > { %p1683_p4 = scmp.eq.s32.totalorder %s1759_s18, 1  ;;  %s826_s15 = sshll.u32 %s1380_s23, 4  ;;  %s827_s15 = int_to_ptr.vmem [resolvable:$true] %s826_s15 }
 0x445   : > { %s1274_s10 = scalar_lea.vmem %s827_s15, 256  ;;  %p1281_p7 = scmp.lt.s32.totalorder %s827_s15, %s827_s15 }
 0x446   : > { %p1275_p5 = scmp.ne.s32.totalorder %s827_s15, %s1274_s10  ;;  %p1282_p13 = scmp.lt.s32.totalorder %s1274_s10, %s1274_s10 }
 0x448   : > { %p1276_p8 = pnand %p1275_p5, %p1683_p4  ;;  %p1283_p2 = por %p1282_p13, %p1281_p7 }
 0x44a   : > { %p1277_p10 = pneg %p1276_p8 }
 0x44c   : > { %p1284_p3 = pnand %p1283_p2, %p1277_p10 }
 0x44e   : > { %1287 = shalt.err (!%p1284_p3)
}
 0x44f   : > { %s1288_s13 = scalar_lea.hbm %s1734_s7, 256 }
 0x450   : > { %p1289_p12 = scmp.ne.s32.totalorder %s1734_s7, %s1288_s13  ;;  %p1294_p6 = scmp.lt.u32.totalorder %s1288_s13, %s1734_s7 }
 0x452   : > { %p1290_p0 = pnand %p1289_p12, %p1683_p4 }
 0x454   : > { %p1291_p11 = pneg %p1290_p0 }
 0x456   : > { %p1296_p9 = pnand %p1294_p6, %p1291_p11 }
 0x458   : > { %1299 = shalt.err (!%p1296_p9)
}
 0x459   : > { %s1381_s22 = smov 128   ;;  %s1382_s24 = smov 8  }
 0x45a   : > { %1050 = dma.vmem_to_hbm [thread:$0]  (%p1683_p4), %s827_s15, 256, %s1734_s7, [#allocation5], %s1381_s22, %s1381_s22, %s1382_s24  }
 0x45b   : > { %1337 = dma.done.wait (%p1683_p4), [#allocation5], 256  }
 0x45c   : > { %1339 = vsyncadd (%p1683_p4), [#allocation5], 4294967040 }
 0x45d PF: > { %s23_s29 = sadd.s32 1, %s1362_s29   ;;  %s1761_s24 = smov %s1346_s25 }
 0x45e   : > { %p20_p1 = scmp.ge.s32.totalorder %s23_s29, 4   ;;  %s1762_s25 = smov %s1350_s26 }
 0x45f   : > { %s1763_s26 = smov %s1558_s19  ;;  %s1764_s27 = smov %s1358_s28 }
 0x460   : > { %s1765_s28 = smov %s1767_s1  ;;  %22 = sbr.rel (!%p20_p1) target bundleno = 9 (0x9), region = 113 }
 0x467   :  { %842 = vsyncpa [#allocation4], 1 }
 0x468   :  { %844 = vsyncpa [#allocation4 + $0x1], 1 }
 0x469   :  { %845 = vsyncpa [#allocation7], 1 }
 0x46a   :  { %846 = vsyncpa [#allocation10], 1 }
 0x46b   :  { %848 = vsyncpa [#allocation10 + $0x1], 1 }
 0x46c   :  { %849 = vsyncpa [#allocation5], 1 }
 0x46d   :  { %851 = vsyncpa [#allocation5 + $0x1], 1 }

</bundles_post_ra>
